<compile_context>
chip_gen: v5e
topology: v5e:2x2
jax: 0.10.0
libtpu: 0.0.40
codegen_flags: <defaults>
</compile_context>

<pallas_src>
import jax
import jax.numpy as jnp
from jax.experimental import pallas as pl
from jax.experimental.pallas import tpu as pltpu

_LANE = 128


def _vmem_budgets():
    """Generation-aware VMEM sizing (v5e/v6e: 128 MiB, v7x: 64 MiB per TC)."""
    try:
        cap = int(pltpu.get_tpu_info().vmem_capacity_bytes)
    except Exception:
        cap = 64 * 1024 * 1024  # conservative default (v7x per-TC VMEM)
    vmem_limit = min((cap * 3) // 4, 96 * 1024 * 1024)  # 48 MiB v7x / 96 MiB v5e,v6e
    data_budget = (vmem_limit * 2) // 3                  # double-buffered block footprint
    target_block = 8 * 1024 * 1024                       # target output bytes per grid step
    return vmem_limit, data_budget, target_block


def _concat_kernel(bmap_ref, fmap_ref, out_ref):
    c1 = bmap_ref.shape[1]
    # Casts are in-kernel VPU ops — free relative to the HBM-bound copy.
    out_ref[:, :c1, :] = bmap_ref[...].astype(jnp.float32)
    out_ref[:, c1:, :] = fmap_ref[...].astype(jnp.float32)


def _cast_kernel(bmap_ref, out_ref):
    out_ref[...] = bmap_ref[...].astype(jnp.float32)


def _pick_tiles(B, HW, per_col_bytes, out_col_bytes, data_budget, target_block):
    """Pick (batch_tile, spatial_tile).

    per_col_bytes: double-buffered bytes of all pipelined blocks per (batch, column).
    out_col_bytes: output bytes per (batch, column) (target-block sizing).
    """
    # --- spatial tile (lane axis = flattened H*W) ---
    if HW <= _LANE:
        tile = HW  # full extent satisfies the (8,128) rule
    else:
        cap = min(HW, data_budget // max(per_col_bytes, 1),
                  target_block // max(out_col_bytes, 1))
        cap = max(_LANE, (cap // _LANE) * _LANE)
        tile = cap
        # Prefer a 128-aligned tile that divides HW (avoids a ragged masked
        # tail block), but never shrink below half the cap for it.
        cand = cap
        while cand >= max(_LANE, cap // 2):
            if HW % cand == 0:
                tile = cand
                break
            cand -= _LANE
    n_spatial = pl.cdiv(HW, tile)

    # --- batch tile: amortize the ~0.35us/step overhead for small maps ---
    b_tile = 1
    if n_spatial == 1:
        by_target = max(1, target_block // max(out_col_bytes * tile, 1))
        by_vmem = max(1, data_budget // max(per_col_bytes * tile, 1))
        b_tile = min(B, by_target, by_vmem)
        for d in range(b_tile, 0, -1):  # prefer a divisor of B (no ragged batch tail)
            if B % d == 0:
                if d * 2 >= b_tile:
                    b_tile = d
                break

    # Keep both TensorCores busy on v7x: never collapse to a single grid step.
    # (On 1-TC chips this costs at most one extra ~0.35us step, only for tiny maps.)
    if B >= 2 and pl.cdiv(B, b_tile) * n_spatial == 1:
        b_tile = pl.cdiv(B, 2)
    return b_tile, tile


def total_map_model(boolean_map, float_map):
    """boolean_map: (B, C1, H, W) bool ; float_map: (B, C2, H, W) float."""
    B, C1, H, W = boolean_map.shape
    HW = H * W

    vmem_limit, data_budget, target_block = _vmem_budgets()
    compiler_params = pltpu.CompilerParams(
        dimension_semantics=("parallel", "parallel"),
        vmem_limit_bytes=vmem_limit,
    )

    # uint8 carrier for the bool map (see header TODO); the lane-dense reshape
    # of trailing contiguous dims is free.
    bmap = boolean_map.astype(jnp.uint8).reshape(B, C1, HW)

    # torch's try/except around torch.cat: concat succeeds iff all non-channel
    # dims match. Shapes are static in JAX, so resolve the branch here.
    concat_ok = (
        getattr(float_map, "ndim", 0) == 4
        and float_map.shape[0] == B
        and float_map.shape[2] == H
        and float_map.shape[3] == W
    )

    if not concat_ok:
        # Fallback: just the float32 cast of the boolean map.
        per_col = 2 * (C1 * 1 + C1 * 4)  # double-buffered in + out bytes per column
        out_col = C1 * 4
        b_tile, tile = _pick_tiles(B, HW, per_col, out_col, data_budget, target_block)
        out = pl.pallas_call(
            _cast_kernel,
            out_shape=jax.ShapeDtypeStruct((B, C1, HW), jnp.float32),
            grid=(pl.cdiv(B, b_tile), pl.cdiv(HW, tile)),
            in_specs=[pl.BlockSpec((b_tile, C1, tile), lambda b, s: (b, 0, s))],
            out_specs=pl.BlockSpec((b_tile, C1, tile), lambda b, s: (b, 0, s)),
            compiler_params=compiler_params,
        )(bmap)
        return out.reshape(B, C1, H, W)

    C2 = float_map.shape[1]
    Cout = C1 + C2
    fmap = float_map.reshape(B, C2, HW)  # original dtype; cast happens in-kernel
    f_size = jnp.dtype(float_map.dtype).itemsize

    per_col = 2 * (C1 * 1 + C2 * f_size + Cout * 4)
    out_col = Cout * 4
    b_tile, tile = _pick_tiles(B, HW, per_col, out_col, data_budget, target_block)

    out = pl.pallas_call(
        _concat_kernel,
        out_shape=jax.ShapeDtypeStruct((B, Cout, HW), jnp.float32),
        grid=(pl.cdiv(B, b_tile), pl.cdiv(HW, tile)),
        in_specs=[
            pl.BlockSpec((b_tile, C1, tile), lambda b, s: (b, 0, s)),
            pl.BlockSpec((b_tile, C2, tile), lambda b, s: (b, 0, s)),
        ],
        out_specs=pl.BlockSpec((b_tile, Cout, tile), lambda b, s: (b, 0, s)),
        compiler_params=compiler_params,
    )(bmap, fmap)
    return out.reshape(B, Cout, H, W)


if __name__ == "__main__":
    key = jax.random.PRNGKey(0)
    kb, kf = jax.random.split(key)

    B, C1, C2, H, W = 2, 4, 3, 16, 16
    boolean_map = jax.random.bernoulli(kb, p=0.5, shape=(B, C1, H, W))  # bool
    float_map = jax.random.normal(kf, (B, C2, H, W), dtype=jnp.float32)

    out = jax.block_until_ready(total_map_model(boolean_map, float_map))

    # reference check
    ref = jnp.concatenate([boolean_map.astype(jnp.float32), float_map], axis=1)
    assert out.shape == (B, C1 + C2, H, W), out.shape
    assert out.dtype == jnp.float32
    assert jnp.array_equal(out, ref), "mismatch vs reference"

    # fallback branch (spatial mismatch -> returns cast boolean map only)
    float_bad = jax.random.normal(kf, (B, C2, H, W // 2), dtype=jnp.float32)
    out_fb = jax.block_until_ready(total_map_model(boolean_map, float_bad))
    assert jnp.array_equal(out_fb, boolean_map.astype(jnp.float32))

    print("KERNEL_OK")
</pallas_src>

<mosaic_0001>
module attributes {stable_mosaic.version = 11 : i64} {
  func.func @_concat_kernel(%arg0: i32, %arg1: i32, %arg2: memref<1x4x256xi8, #tpu.memory_space<vmem>>, %arg3: memref<1x3x256xf32, #tpu.memory_space<vmem>>, %arg4: memref<1x7x256xf32, #tpu.memory_space<vmem>>) attributes {dimension_semantics = [#tpu.dimension_semantics<parallel>, #tpu.dimension_semantics<parallel>], iteration_bounds = array<i64: 2, 1>, scalar_prefetch = 0 : i64, scratch_operands = 0 : i64, tpu.core_type = #tpu.core_type<tc>, window_params = [{transform_indices = @transform_0, window_bounds = array<i64: 1, 4, 256>}, {transform_indices = @transform_1, window_bounds = array<i64: 1, 3, 256>}, {transform_indices = @transform_2, window_bounds = array<i64: 1, 7, 256>}]} {
    %c0 = arith.constant 0 : index
    %c0_0 = arith.constant 0 : index
    %c0_1 = arith.constant 0 : index
    %0 = vector.load %arg2[%c0, %c0_0, %c0_1] : memref<1x4x256xi8, #tpu.memory_space<vmem>>, vector<1x4x256xi8>
    %1 = arith.uitofp %0 : vector<1x4x256xi8> to vector<1x4x256xf32>
    %c0_2 = arith.constant 0 : index
    %c0_3 = arith.constant 0 : index
    %c0_4 = arith.constant 0 : index
    %2 = vector.load %arg4[%c0_2, %c0_3, %c0_4] : memref<1x7x256xf32, #tpu.memory_space<vmem>>, vector<1x4x256xf32>
    tpu.vector_store %arg4[%c0_2, %c0_3, %c0_4], %1 {strides = array<i32>} : memref<1x7x256xf32, #tpu.memory_space<vmem>>, vector<1x4x256xf32>,
    %c0_5 = arith.constant 0 : index
    %c0_6 = arith.constant 0 : index
    %c0_7 = arith.constant 0 : index
    %3 = vector.load %arg3[%c0_5, %c0_6, %c0_7] : memref<1x3x256xf32, #tpu.memory_space<vmem>>, vector<1x3x256xf32>
    %c0_8 = arith.constant 0 : index
    %c4 = arith.constant 4 : index
    %c0_9 = arith.constant 0 : index
    %4 = vector.load %arg4[%c0_8, %c4, %c0_9] : memref<1x7x256xf32, #tpu.memory_space<vmem>>, vector<1x3x256xf32>
    tpu.vector_store %arg4[%c0_8, %c4, %c0_9], %3 {strides = array<i32>} : memref<1x7x256xf32, #tpu.memory_space<vmem>>, vector<1x3x256xf32>,
    return
  }
  func.func @transform_0(%arg0: i32, %arg1: i32) -> (i32, i32, i32) {
    %c0_i32 = arith.constant 0 : i32
    %c0_i32_0 = arith.constant 0 : i32
    return %arg0, %c0_i32, %arg1 : i32, i32, i32
  }
  func.func @transform_1(%arg0: i32, %arg1: i32) -> (i32, i32, i32) {
    %c0_i32 = arith.constant 0 : i32
    %c0_i32_0 = arith.constant 0 : i32
    return %arg0, %c0_i32, %arg1 : i32, i32, i32
  }
  func.func @transform_2(%arg0: i32, %arg1: i32) -> (i32, i32, i32) {
    %c0_i32 = arith.constant 0 : i32
    %c0_i32_0 = arith.constant 0 : i32
    return %arg0, %c0_i32, %arg1 : i32, i32, i32
  }
}

</mosaic_0001>

<bundles_post_ra>
// kernel: tpu_custom_call.1
= control target key start
LH: loop header
LB: loop body
LE: loop exit
PB: predicated region body
PF: predicated region fallthrough
CT: control target
= control target key end

     0   :  { %s417_s9 = smov 0   ;;  %s419_s10 = smov 0   ;;  %s453_s0 = inlined_call_operand.vmem [shape: u8[2,4,256], index: 0, kind: input, shape index: {}]   ;;  %s454_s1 = inlined_call_operand.vmem [shape: f32[2,3,256], index: 1, kind: input, shape index: {}]   ;;  %s455_s2 = inlined_call_operand.vmem [shape: f32[2,7,256], index: 2, kind: output, shape index: {}]  }
   0x1   :  { %s421_s11 = smov 0  }
   0x2 LB: > { %s24_s12 = sadd.s32 1, %s396_s10  ;;  %p344_p0 = scmp.ge.s32.totalorder %s400_s11, 1  ;;  %s400_s11 = sphi %s421_s11, %s12_s11   ;;  %s396_s10 = sphi %s419_s10, %s457_s10   ;;  %s392_s9 = sphi %s417_s9, %s456_s9  }
   0x3   : > { %p26_p1 = scmp.ge.s32.totalorder %s24_s12, 2  ;;  %p149_p2 = scmp.lt.s32.totalorder %s400_s11, 3 }
   0x5   : > { %s459_s12 = smov (%p26_p1, %s24_s12), 0  ;;  %p150_p3 = pnand %p344_p0, %p149_p2 }
   0x6   : > { %p188_p4 = scmp.lt.s32.totalorder (!%p150_p3), %s392_s9, 1 }
   0x7   : > { %153 = sbr.rel (%p150_p3) target bundleno = 42 (0x2a), region = 28 }
   0xc   : > { %s461_s9 = smov (!%p188_p4, %s392_s9), 1 }
   0xd   : > { %s345_s13 = sshll.u32 %s461_s9, 1  ;;  %s352_s17 = sshll.u32 %s461_s9, 3 }
   0xe   : > { %s194_s16 = scalar_lea.vmem %s453_s0, %s345_s13  ;;  %s353_s18 = sshll.u32 %s461_s9, 4 }
   0xf   : > { %v216_v0 = vld [vmem:[%s194_s16] sm:$0x3]  ;;  %s204_s21 = scalar_lea.vmem %s454_s1, %s352_s17  ;;  %s214_s24 = scalar_lea.vmem %s455_s2, %s353_s18 }
  0x10   : > { %v217_v1 = vunpack.c.0.s8 %v216_v0  ;;  %v228_v4 = vld [vmem:[%s204_s21] sm:$0x77] }
  0x12   : > { %v218_v2 = vand.u32 255, %v217_v1 }
  0x14   : > { %v219_v3 = vcvt.s32.f32 %v218_v2 }
  0x16   : > { %221 = vst [vmem:[#allocation1] ss:$2 sm:$0xff] %v219_v3 }
  0x1d   : > { %v222_v5 = vld.sshfl [vmem:[#allocation1] sm:$0xff pattern:$0x75316420]  ;;  %v223_v6 = vld.sshfl [vmem:[#allocation1 + $0x8] sm:$0xff pattern:$0x75316420] }
  0x1e   : > { %226 = vst [vmem:[%s214_s24] sm:$0xf] %v222_v5 }
  0x1f   : > { %227 = vst [vmem:[%s214_s24 + $0x8] sm:$0xf] %v223_v6 }
  0x20   : > { %231 = vst [vmem:[#allocation1 + $0x1] ss:$2 sm:$0xff] %v228_v4 }
  0x27   : > { %v232_v7 = vld.sshfl [vmem:[#allocation1] sm:$0xff pattern:$0x75316420]  ;;  %v233_v8 = vld.sshfl [vmem:[#allocation1 + $0x8] sm:$0xff pattern:$0x75316420] }
  0x28   : > { %236 = vst [vmem:[%s214_s24] sm:$0x70] %v232_v7 }
  0x29   : > { %237 = vst [vmem:[%s214_s24 + $0x8] sm:$0x70] %v233_v8 }
  0x2a PF: > { %s12_s11 = sadd.s32 1, %s400_s11   ;;  %s456_s9 = smov %s396_s10 }
  0x2b   : > { %p9_p5 = scmp.ge.s32.totalorder %s12_s11, 4   ;;  %s457_s10 = smov %s459_s12 }
  0x2d   :  { %11 = sbr.rel (!%p9_p5) target bundleno = 2 (0x2), region = 62 }

</bundles_post_ra>
